<compile_context>
chip_gen: v7x
topology: tpu7x:2x2x1
jax: 0.10.0
libtpu: 0.0.40
codegen_flags: <defaults>
</compile_context>

<pallas_src>
import jax
import jax.numpy as jnp
from jax import lax
from jax.experimental import pallas as pl
from jax.experimental.pallas import tpu as pltpu


def _round_up(x, m):
    return ((x + m - 1) // m) * m


def _mfg_linear_kernel(x_ref, wm_ref, lws_ref, wn_ref, bm_ref, lbs_ref, bn_ref,
                       y_ref, acc_ref):
    k = pl.program_id(2)

    @pl.when(k == 0)
    def _():
        acc_ref[...] = jnp.zeros_like(acc_ref)

    # Reparameterized weight sample for this (tn, tk) tile (VPU + EUP).
    w = wm_ref[...] + jnp.exp(lws_ref[...]) * wn_ref[...]              # (tn, tk)

    # y_tile += x_tile @ W_tile^T, expressed as a contraction on W's in_features
    # axis so Mosaic feeds the MXU in native layout (no transpose/relayout).
    acc_ref[...] += lax.dot_general(
        x_ref[...], w,
        dimension_numbers=(((1,), (1,)), ((), ())),
        preferred_element_type=jnp.float32)

    @pl.when(k == pl.num_programs(2) - 1)
    def _():
        # Reparameterized bias sample (1, tn), broadcast over the batch tile.
        b = bm_ref[...] + jnp.exp(lbs_ref[...]) * bn_ref[...]
        y_ref[...] = (acc_ref[...] + b).astype(y_ref.dtype)


def mean_field_gaussian_feed_forward(x, weights_mean, log_weights_sigma, w_noise,
                                     bias_mean, log_bias_sigma, b_noise,
                                     *, tm=256, tn=512, tk=512):
    """x: (B, in_f); weights_*: (out_f, in_f); bias_*: (1, out_f). Returns (B, out_f)."""
    B, in_f = x.shape
    out_f, in_g = weights_mean.shape
    assert in_g == in_f, "groups != 1 not supported in this kernel"

    # Clamp tile sizes to the (8, 128)-aligned problem size, then pad so tiles divide.
    tm = min(tm, _round_up(B, 8))
    tn = min(tn, _round_up(out_f, 128))
    tk = min(tk, _round_up(in_f, 128))
    Bp = _round_up(B, tm)
    Np = _round_up(out_f, tn)
    Kp = _round_up(in_f, tk)

    def pad2(a, rows, cols):
        return jnp.pad(a, ((0, rows - a.shape[0]), (0, cols - a.shape[1])))

    # Zero padding is exact: padded mean=0 and noise=0 give sampled value 0, so
    # padded K columns contribute nothing and padded N/B rows are sliced off.
    xp = pad2(x, Bp, Kp)
    wmp = pad2(weights_mean, Np, Kp)
    lwsp = pad2(log_weights_sigma, Np, Kp)
    wnp = pad2(w_noise, Np, Kp)
    bmp = pad2(bias_mean, 1, Np)
    lbsp = pad2(log_bias_sigma, 1, Np)
    bnp = pad2(b_noise, 1, Np)

    grid = (Bp // tm, Np // tn, Kp // tk)

    x_spec = pl.BlockSpec((tm, tk), lambda i, j, k: (i, k))
    w_spec = pl.BlockSpec((tn, tk), lambda i, j, k: (j, k))
    b_spec = pl.BlockSpec((1, tn), lambda i, j, k: (0, j))
    out_spec = pl.BlockSpec((tm, tn), lambda i, j, k: (i, j))

    cost = pl.CostEstimate(
        flops=2 * Bp * Kp * Np,
        transcendentals=Np * Kp + Np,
        bytes_accessed=4 * (xp.size + wmp.size + lwsp.size + wnp.size
                            + bmp.size + lbsp.size + bnp.size + Bp * Np),
    )

    yp = pl.pallas_call(
        _mfg_linear_kernel,
        out_shape=jax.ShapeDtypeStruct((Bp, Np), jnp.float32),
        grid_spec=pltpu.PrefetchScalarGridSpec(
            num_scalar_prefetch=0,
            grid=grid,
            in_specs=[x_spec, w_spec, w_spec, w_spec, b_spec, b_spec, b_spec],
            out_specs=out_spec,
            scratch_shapes=[pltpu.VMEM((tm, tn), jnp.float32)],
        ),
        compiler_params=pltpu.CompilerParams(
            dimension_semantics=("parallel", "parallel", "arbitrary"),
            vmem_limit_bytes=32 * 1024 * 1024,
        ),
        cost_estimate=cost,
    )(xp, wmp, lwsp, wnp, bmp, lbsp, bnp)

    return yp[:B, :out_f]


def _make_inputs(key, batch, in_features, out_features, groups=1,
                 weight_prior_sigma=1.0, bias_prior_sigma=1.0,
                 init_prior_sigma_scale=0.01):
    k_wm, k_bm, k_x, k_wn, k_bn = jax.random.split(key, 5)
    in_per_group = round(in_features / groups)
    # Parameter init mirroring the module's __init__ (init_mean_zero=False):
    weights_mean = jax.random.uniform(
        k_wm, (out_features, in_per_group), jnp.float32) - 0.5
    log_weights_sigma = jnp.full(
        (out_features, in_per_group),
        jnp.log(init_prior_sigma_scale * weight_prior_sigma), dtype=jnp.float32)
    bias_mean = (jax.random.uniform(k_bm, (out_features,), jnp.float32)
                 - 0.5).reshape(1, out_features)
    log_bias_sigma = jnp.full(
        (1, out_features),
        jnp.log(init_prior_sigma_scale * bias_prior_sigma), dtype=jnp.float32)
    # Deterministic "sample_transform" noise draws (stochastic=True path).
    w_noise = jax.random.normal(k_wn, (out_features, in_per_group), jnp.float32)
    b_noise = jax.random.normal(k_bn, (1, out_features), jnp.float32)
    x = jax.random.normal(k_x, (batch, in_features), jnp.float32)
    return x, weights_mean, log_weights_sigma, w_noise, bias_mean, log_bias_sigma, b_noise


def _reference(x, wm, lws, wn, bm, lbs, bn):
    w = wm + jnp.exp(lws) * wn
    b = bm + jnp.exp(lbs) * bn
    return x @ w.T + b


if __name__ == "__main__":
    key = jax.random.PRNGKey(0)
    k1, k2 = jax.random.split(key)

    # Case 1: small, lane-dense / MXU-friendly shapes (multiples of 8 / 128).
    args1 = _make_inputs(k1, batch=8, in_features=128, out_features=128)
    y1 = jax.block_until_ready(mean_field_gaussian_feed_forward(*args1))
    y1_ref = _reference(*args1)
    assert y1.shape == (8, 128)
    assert jnp.allclose(y1, y1_ref, atol=1e-5, rtol=1e-5)

    # Case 2: unaligned small shapes, exercising the zero-padding path.
    args2 = _make_inputs(k2, batch=5, in_features=32, out_features=48)
    y2 = jax.block_until_ready(mean_field_gaussian_feed_forward(*args2))
    y2_ref = _reference(*args2)
    assert y2.shape == (5, 48)
    assert jnp.allclose(y2, y2_ref, atol=1e-5, rtol=1e-5)

    print("KERNEL_OK")
</pallas_src>

<mosaic_0001>
module attributes {stable_mosaic.version = 11 : i64} {
  func.func @_mfg_linear_kernel(%arg0: i32, %arg1: i32, %arg2: i32, %arg3: memref<8x128xf32, #tpu.memory_space<vmem>>, %arg4: memref<128x128xf32, #tpu.memory_space<vmem>>, %arg5: memref<128x128xf32, #tpu.memory_space<vmem>>, %arg6: memref<128x128xf32, #tpu.memory_space<vmem>>, %arg7: memref<1x128xf32, #tpu.memory_space<vmem>>, %arg8: memref<1x128xf32, #tpu.memory_space<vmem>>, %arg9: memref<1x128xf32, #tpu.memory_space<vmem>>, %arg10: memref<8x128xf32, #tpu.memory_space<vmem>>, %arg11: memref<8x128xf32, #tpu.memory_space<vmem>>) attributes {dimension_semantics = [#tpu.dimension_semantics<parallel>, #tpu.dimension_semantics<parallel>, #tpu.dimension_semantics<arbitrary>], iteration_bounds = array<i64: 1, 1, 1>, scalar_prefetch = 0 : i64, scratch_operands = 1 : i64, tpu.core_type = #tpu.core_type<tc>, window_params = [{transform_indices = @transform_0, window_bounds = array<i64: 8, 128>}, {transform_indices = @transform_1, window_bounds = array<i64: 128, 128>}, {transform_indices = @transform_2, window_bounds = array<i64: 128, 128>}, {transform_indices = @transform_3, window_bounds = array<i64: 128, 128>}, {transform_indices = @transform_4, window_bounds = array<i64: 1, 128>}, {transform_indices = @transform_5, window_bounds = array<i64: 1, 128>}, {transform_indices = @transform_6, window_bounds = array<i64: 1, 128>}, {transform_indices = @transform_7, window_bounds = array<i64: 8, 128>}]} {
    %c0_i32 = arith.constant 0 : i32
    %0 = arith.cmpi eq, %arg2, %c0_i32 : i32
    %1 = arith.extui %0 : i1 to i32
    %c0_i32_0 = arith.constant 0 : i32
    %2 = arith.cmpi ne, %1, %c0_i32_0 : i32
    scf.if %2 {
      %cst_14 = arith.constant 0.000000e+00 : f32
      %17 = vector.broadcast %cst_14 : f32 to vector<8x128xf32>
      %c0_15 = arith.constant 0 : index
      %c0_16 = arith.constant 0 : index
      %18 = vector.load %arg11[%c0_15, %c0_16] : memref<8x128xf32, #tpu.memory_space<vmem>>, vector<8x128xf32>
      tpu.vector_store %arg11[%c0_15, %c0_16], %17 {strides = array<i32>} : memref<8x128xf32, #tpu.memory_space<vmem>>, vector<8x128xf32>,
    } else {
    }
    %c0 = arith.constant 0 : index
    %c0_1 = arith.constant 0 : index
    %3 = vector.load %arg4[%c0, %c0_1] : memref<128x128xf32, #tpu.memory_space<vmem>>, vector<128x128xf32>
    %c0_2 = arith.constant 0 : index
    %c0_3 = arith.constant 0 : index
    %4 = vector.load %arg5[%c0_2, %c0_3] : memref<128x128xf32, #tpu.memory_space<vmem>>, vector<128x128xf32>
    %5 = math.exp %4 : vector<128x128xf32>
    %c0_4 = arith.constant 0 : index
    %c0_5 = arith.constant 0 : index
    %6 = vector.load %arg6[%c0_4, %c0_5] : memref<128x128xf32, #tpu.memory_space<vmem>>, vector<128x128xf32>
    %7 = arith.mulf %5, %6 : vector<128x128xf32>
    %8 = arith.addf %3, %7 : vector<128x128xf32>
    %c0_6 = arith.constant 0 : index
    %c0_7 = arith.constant 0 : index
    %9 = vector.load %arg11[%c0_6, %c0_7] : memref<8x128xf32, #tpu.memory_space<vmem>>, vector<8x128xf32>
    %c0_8 = arith.constant 0 : index
    %c0_9 = arith.constant 0 : index
    %10 = vector.load %arg3[%c0_8, %c0_9] : memref<8x128xf32, #tpu.memory_space<vmem>>, vector<8x128xf32>
    %cst = arith.constant dense<0.000000e+00> : vector<8x128xf32>
    %11 = tpu.matmul %10, %8, %cst {dimension_numbers = #tpu.dot_dimension_numbers<[1], [1], [0], [0], [0, 0, 1, 0], [], []>} : vector<8x128xf32>, vector<128x128xf32>, vector<8x128xf32> -> vector<8x128xf32>
    %12 = arith.addf %9, %11 : vector<8x128xf32>
    %c0_10 = arith.constant 0 : index
    %c0_11 = arith.constant 0 : index
    %13 = vector.load %arg11[%c0_10, %c0_11] : memref<8x128xf32, #tpu.memory_space<vmem>>, vector<8x128xf32>
    tpu.vector_store %arg11[%c0_10, %c0_11], %12 {strides = array<i32>} : memref<8x128xf32, #tpu.memory_space<vmem>>, vector<8x128xf32>,
    %c0_i32_12 = arith.constant 0 : i32
    %14 = arith.cmpi eq, %arg2, %c0_i32_12 : i32
    %15 = arith.extui %14 : i1 to i32
    %c0_i32_13 = arith.constant 0 : i32
    %16 = arith.cmpi ne, %15, %c0_i32_13 : i32
    scf.if %16 {
      %c0_14 = arith.constant 0 : index
      %c0_15 = arith.constant 0 : index
      %17 = vector.load %arg7[%c0_14, %c0_15] : memref<1x128xf32, #tpu.memory_space<vmem>>, vector<1x128xf32>
      %c0_16 = arith.constant 0 : index
      %c0_17 = arith.constant 0 : index
      %18 = vector.load %arg8[%c0_16, %c0_17] : memref<1x128xf32, #tpu.memory_space<vmem>>, vector<1x128xf32>
      %19 = math.exp %18 : vector<1x128xf32>
      %c0_18 = arith.constant 0 : index
      %c0_19 = arith.constant 0 : index
      %20 = vector.load %arg9[%c0_18, %c0_19] : memref<1x128xf32, #tpu.memory_space<vmem>>, vector<1x128xf32>
      %21 = arith.mulf %19, %20 : vector<1x128xf32>
      %22 = arith.addf %17, %21 : vector<1x128xf32>
      %c0_20 = arith.constant 0 : index
      %c0_21 = arith.constant 0 : index
      %23 = vector.load %arg11[%c0_20, %c0_21] : memref<8x128xf32, #tpu.memory_space<vmem>>, vector<8x128xf32>
      %24 = vector.broadcast %22 : vector<1x128xf32> to vector<8x128xf32>
      %25 = arith.addf %23, %24 : vector<8x128xf32>
      %c0_22 = arith.constant 0 : index
      %c0_23 = arith.constant 0 : index
      %26 = vector.load %arg10[%c0_22, %c0_23] : memref<8x128xf32, #tpu.memory_space<vmem>>, vector<8x128xf32>
      tpu.vector_store %arg10[%c0_22, %c0_23], %25 {strides = array<i32>} : memref<8x128xf32, #tpu.memory_space<vmem>>, vector<8x128xf32>,
    } else {
    }
    return
  }
  func.func @transform_0(%arg0: i32, %arg1: i32, %arg2: i32) -> (i32, i32) {
    %c0_i32 = arith.constant 0 : i32
    return %arg0, %arg2 : i32, i32
  }
  func.func @transform_1(%arg0: i32, %arg1: i32, %arg2: i32) -> (i32, i32) {
    %c0_i32 = arith.constant 0 : i32
    return %arg1, %arg2 : i32, i32
  }
  func.func @transform_2(%arg0: i32, %arg1: i32, %arg2: i32) -> (i32, i32) {
    %c0_i32 = arith.constant 0 : i32
    return %arg1, %arg2 : i32, i32
  }
  func.func @transform_3(%arg0: i32, %arg1: i32, %arg2: i32) -> (i32, i32) {
    %c0_i32 = arith.constant 0 : i32
    return %arg1, %arg2 : i32, i32
  }
  func.func @transform_4(%arg0: i32, %arg1: i32, %arg2: i32) -> (i32, i32) {
    %c0_i32 = arith.constant 0 : i32
    %c0_i32_0 = arith.constant 0 : i32
    return %c0_i32, %arg1 : i32, i32
  }
  func.func @transform_5(%arg0: i32, %arg1: i32, %arg2: i32) -> (i32, i32) {
    %c0_i32 = arith.constant 0 : i32
    %c0_i32_0 = arith.constant 0 : i32
    return %c0_i32, %arg1 : i32, i32
  }
  func.func @transform_6(%arg0: i32, %arg1: i32, %arg2: i32) -> (i32, i32) {
    %c0_i32 = arith.constant 0 : i32
    %c0_i32_0 = arith.constant 0 : i32
    return %c0_i32, %arg1 : i32, i32
  }
  func.func @transform_7(%arg0: i32, %arg1: i32, %arg2: i32) -> (i32, i32) {
    %c0_i32 = arith.constant 0 : i32
    return %arg0, %arg1 : i32, i32
  }
}

</mosaic_0001>

<bundles_post_ra>
// kernel: tpu_custom_call.1
= control target key start
LH: loop header
LB: loop body
LE: loop exit
PB: predicated region body
PF: predicated region fallthrough
CT: control target
= control target key end

     0   :  { %12 = vsyncpa [#allocation4], 0  ;;  %s681_s0 = inlined_call_operand.hbm [shape: f32[8,128], index: 0, kind: input, shape index: {}]   ;;  %s682_s1 = inlined_call_operand.hbm [shape: f32[128,128], index: 1, kind: input, shape index: {}]   ;;  %s683_s2 = inlined_call_operand.hbm [shape: f32[128,128], index: 2, kind: input, shape index: {}]   ;;  %s684_s3 = inlined_call_operand.hbm [shape: f32[128,128], index: 3, kind: input, shape index: {}]   ;;  %s685_s4 = inlined_call_operand.vmem [shape: f32[1,128], index: 4, kind: input, shape index: {}]   ;;  %s686_s5 = inlined_call_operand.vmem [shape: f32[1,128], index: 5, kind: input, shape index: {}]   ;;  %s687_s6 = inlined_call_operand.vmem [shape: f32[1,128], index: 6, kind: input, shape index: {}]   ;;  %s688_s7 = inlined_call_operand.hbm [shape: f32[8,128], index: 7, kind: output, shape index: {}]  }
   0x1   :  { %13 = vsyncpa [#allocation7], 0 }
   0x2   :  { %14 = vsyncpa [#allocation10], 0 }
   0x3   :  { %15 = vsyncpa [#allocation5], 0  ;;  %s545_s24 = smov [#allocation6]   ;;  %s427_s28 = scalar_lea.hbm %s682_s1, 2048 }
   0x4   :  { %s31_s25 = sshll.u32 %s545_s24, 4  ;;  %p428_p0 = scmp.ne.s32.totalorder %s682_s1, %s427_s28  ;;  %s32_s25 = int_to_ptr.vmem [resolvable:$true] %s31_s25 }
   0x5   :  { %p431_p1 = scmp.lt.u32.totalorder %s427_s28, %s682_s1 }
   0x7   :  { %p433_p2 = pnand %p431_p1, %p428_p0 }
   0x9   :  { %436 = shalt.err (!%p433_p2)
}
   0xa   :  { %s437_s10 = scalar_lea.vmem %s32_s25, 2048  ;;  %p442_p4 = scmp.lt.s32.totalorder %s32_s25, %s32_s25 }
   0xb   :  { %p438_p3 = scmp.ne.s32.totalorder %s32_s25, %s437_s10  ;;  %p443_p5 = scmp.lt.s32.totalorder %s437_s10, %s437_s10 }
   0xd   :  { %p444_p6 = por %p443_p5, %p442_p4 }
   0xf   :  { %p445_p7 = pnand %p444_p6, %p438_p3 }
  0x11   :  { %448 = shalt.err (!%p445_p7)
}
  0x12   :  { %s546_s11 = smov 128   ;;  %s547_s12 = smov 8  }
  0x13   :  { %37 = dma.hbm_to_vmem [thread:$0]  %s682_s1, 2048, %s32_s25, [#allocation7], %s546_s11, %s546_s11, %s547_s12  }
  0x14   :  { %s548_s15 = smov [#allocation3]   ;;  %s549_s17 = smov [#allocation8]  }
  0x15   :  { %s22_s16 = sshll.u32 %s548_s15, 4  ;;  %s43_s18 = sshll.u32 %s549_s17, 4  ;;  %s23_s16 = int_to_ptr.vmem [resolvable:$true] %s22_s16  ;;  %s44_s18 = int_to_ptr.vmem [resolvable:$true] %s43_s18 }
  0x16   :  { %s449_s21 = scalar_lea.hbm %s681_s0, 128 }
  0x17   :  { %p450_p8 = scmp.ne.s32.totalorder %s681_s0, %s449_s21  ;;  %p453_p9 = scmp.lt.u32.totalorder %s449_s21, %s681_s0 }
  0x19   :  { %p455_p10 = pnand %p453_p9, %p450_p8 }
  0x1b   :  { %458 = shalt.err (!%p455_p10)
}
  0x1c   :  { %s459_s1 = scalar_lea.vmem %s23_s16, 128  ;;  %p464_p12 = scmp.lt.s32.totalorder %s23_s16, %s23_s16 }
  0x1d   :  { %p460_p11 = scmp.ne.s32.totalorder %s23_s16, %s459_s1  ;;  %p465_p13 = scmp.lt.s32.totalorder %s459_s1, %s459_s1 }
  0x1f   :  { %p466_p0 = por %p465_p13, %p464_p12 }
  0x21   :  { %p467_p1 = pnand %p466_p0, %p460_p11 }
  0x23   :  { %470 = shalt.err (!%p467_p1)
}
  0x24   :  { %25 = dma.hbm_to_vmem [thread:$0]  %s681_s0, 128, %s23_s16, [#allocation4]  }
  0x25   :  { %s471_s30 = scalar_lea.hbm %s683_s2, 2048 }
  0x26   :  { %p472_p2 = scmp.ne.s32.totalorder %s683_s2, %s471_s30  ;;  %p475_p3 = scmp.lt.u32.totalorder %s471_s30, %s683_s2 }
  0x28   :  { %p477_p4 = pnand %p475_p3, %p472_p2 }
  0x2a   :  { %480 = shalt.err (!%p477_p4)
}
  0x2b   :  { %s481_s14 = scalar_lea.vmem %s44_s18, 2048  ;;  %p486_p6 = scmp.lt.s32.totalorder %s44_s18, %s44_s18 }
  0x2c   :  { %p482_p5 = scmp.ne.s32.totalorder %s44_s18, %s481_s14  ;;  %p487_p7 = scmp.lt.s32.totalorder %s481_s14, %s481_s14 }
  0x2e   :  { %p488_p8 = por %p487_p7, %p486_p6 }
  0x30   :  { %p489_p9 = pnand %p488_p8, %p482_p5 }
  0x32   :  { %492 = shalt.err (!%p489_p9)
}
  0x33   :  { %49 = dma.hbm_to_vmem [thread:$0]  %s683_s2, 2048, %s44_s18, [#allocation7], %s546_s11, %s546_s11, %s547_s12  }
  0x34   :  { %s550_s16 = smov [#allocation9]   ;;  %s493_s21 = scalar_lea.hbm %s684_s3, 2048 }
  0x35   :  { %s55_s17 = sshll.u32 %s550_s16, 4  ;;  %p494_p10 = scmp.ne.s32.totalorder %s684_s3, %s493_s21  ;;  %s56_s17 = int_to_ptr.vmem [resolvable:$true] %s55_s17 }
  0x36   :  { %p497_p11 = scmp.lt.u32.totalorder %s493_s21, %s684_s3 }
  0x38   :  { %p499_p12 = pnand %p497_p11, %p494_p10 }
  0x3a   :  { %502 = shalt.err (!%p499_p12)
}
  0x3b   :  { %s503_s1 = scalar_lea.vmem %s56_s17, 2048  ;;  %p508_p0 = scmp.lt.s32.totalorder %s56_s17, %s56_s17 }
  0x3c   :  { %p504_p13 = scmp.ne.s32.totalorder %s56_s17, %s503_s1  ;;  %p509_p1 = scmp.lt.s32.totalorder %s503_s1, %s503_s1 }
  0x3e   :  { %p510_p2 = por %p509_p1, %p508_p0 }
  0x40   :  { %p511_p3 = pnand %p510_p2, %p504_p13 }
  0x42   :  { %514 = shalt.err (!%p511_p3)
}
  0x43   :  { %61 = dma.hbm_to_vmem [thread:$0]  %s684_s3, 2048, %s56_s17, [#allocation10], %s546_s11, %s546_s11, %s547_s12  }
  0x44   :  { %537 = dma.done.wait [#allocation4], 128  }
  0x45   :  { %538 = vsyncadd [#allocation4], 4294967168 }
  0x46   :  { %539 = dma.done.wait [#allocation7], 4096  }
  0x47   :  { %540 = vsyncadd [#allocation7], 4294963200 }
  0x48   :  { %541 = dma.done.wait [#allocation10], 2048  }
  0x49   :  { %542 = vsyncadd [#allocation10], 4294965248  ;;  %v551_v0 = vmov 0.0|0.0   ;;  %vm552_vm0 = vmmov 0   ;;  %v553_v1 = vmov 0.0   ;;  %v101_v2 = vld [vmem:[#allocation8] sm:$0xff] }
  0x4a   :  { %359 = vmatprep.subr.bf16.mxu0 %v551_v0  ;;  %356 = vmatprep.mubr.msk.f32.mxu0 %vm552_vm0, %v553_v1  ;;  %v102_v3 = vld [vmem:[#allocation8 + $0x8] sm:$0xff]  ;;  %v117_v4 = vmul.f32 1.442695, %v101_v2  ;;  %v103_v6 = vld [vmem:[#allocation8 + $0x10] sm:$0xff]  ;;  %v104_v7 = vld [vmem:[#allocation8 + $0x18] sm:$0xff]  ;;  %s554_s29 = smov [#allocation11]  }
  0x4b   :  { %v119_v5 = vmul.f32 1.442695, %v102_v3  ;;  %v121_v8 = vmul.f32 1.442695, %v103_v6  ;;  %v123_v9 = vmul.f32 1.442695, %v104_v7 }
  0x4c   :  { %393 = vpow2.f32 %v117_v4  ;;  %v105_v10 = vld [vmem:[#allocation8 + $0x20] sm:$0xff]  ;;  %v106_v11 = vld [vmem:[#allocation8 + $0x28] sm:$0xff]  ;;  %v107_v16 = vld [vmem:[#allocation8 + $0x30] sm:$0xff]  ;;  %s296_s30 = sshll.u32 %s554_s29, 4  ;;  %s297_s30 = int_to_ptr.vmem [resolvable:$true] %s296_s30 }
  0x4d   :  { %395 = vpow2.f32 %v119_v5  ;;  %v125_v12 = vmul.f32 1.442695, %v105_v10  ;;  %v127_v13 = vmul.f32 1.442695, %v106_v11  ;;  %v149_v14 = vld [vmem:[#allocation9] sm:$0xff]  ;;  %v150_v15 = vld [vmem:[#allocation9 + $0x8] sm:$0xff]  ;;  %p520_p5 = scmp.lt.s32.totalorder %s297_s30, %s297_s30 }
  0x4e   :  { %397 = vpow2.f32 %v121_v8  ;;  %v85_v18 = vld [vmem:[#allocation6] sm:$0xff]  ;;  %v108_v19 = vld [vmem:[#allocation8 + $0x38] sm:$0xff]  ;;  %v86_v21 = vld [vmem:[#allocation6 + $0x8] sm:$0xff]  ;;  %v129_v27 = vmul.f32 1.442695, %v107_v16 }
  0x4f   :  { %399 = vpow2.f32 %v123_v9  ;;  %v151_v23 = vld [vmem:[#allocation9 + $0x10] sm:$0xff]  ;;  %v152_v24 = vld [vmem:[#allocation9 + $0x18] sm:$0xff]  ;;  %v131_v30 = vmul.f32 1.442695, %v108_v19  ;;  %v109_v37 = vld [vmem:[#allocation8 + $0x40] sm:$0xff] }
  0x50   :  { %401 = vpow2.f32 %v125_v12  ;;  %v87_v34 = vld [vmem:[#allocation6 + $0x10] sm:$0xff]  ;;  %v88_v35 = vld [vmem:[#allocation6 + $0x18] sm:$0xff]  ;;  %v110_v41 = vld [vmem:[#allocation8 + $0x48] sm:$0xff]  ;;  %v133_v45 = vmul.f32 1.442695, %v109_v37 }
  0x51   :  { %403 = vpow2.f32 %v127_v13  ;;  %v153_v43 = vld [vmem:[#allocation9 + $0x20] sm:$0xff]  ;;  %v154_v44 = vld [vmem:[#allocation9 + $0x28] sm:$0xff]  ;;  %v135_v46 = vmul.f32 1.442695, %v110_v41  ;;  %v111_v52 = vld [vmem:[#allocation8 + $0x50] sm:$0xff] }
  0x52   :  { %405 = vpow2.f32 %v129_v27  ;;  %v89_v50 = vld [vmem:[#allocation6 + $0x20] sm:$0xff]  ;;  %v90_v51 = vld [vmem:[#allocation6 + $0x28] sm:$0xff]  ;;  %v112_v56 = vld [vmem:[#allocation8 + $0x58] sm:$0xff]  ;;  %v137_v60 = vmul.f32 1.442695, %v111_v52 }
  0x53   :  { %407 = vpow2.f32 %v131_v30  ;;  %v155_v58 = vld [vmem:[#allocation9 + $0x30] sm:$0xff]  ;;  %v156_v59 = vld [vmem:[#allocation9 + $0x38] sm:$0xff]  ;;  %v139_v61 = vmul.f32 1.442695, %v112_v56  ;;  %v113_v4 = vld [vmem:[#allocation8 + $0x60] sm:$0xff] }
  0x54   :  { %409 = vpow2.f32 %v133_v45  ;;  %v91_v2 = vld [vmem:[#allocation6 + $0x30] sm:$0xff]  ;;  %v92_v3 = vld [vmem:[#allocation6 + $0x38] sm:$0xff]  ;;  %v114_v8 = vld [vmem:[#allocation8 + $0x68] sm:$0xff]  ;;  %v141_v12 = vmul.f32 1.442695, %v113_v4 }
  0x55   :  { %411 = vpow2.f32 %v135_v46  ;;  %v157_v10 = vld [vmem:[#allocation9 + $0x40] sm:$0xff]  ;;  %v158_v11 = vld [vmem:[#allocation9 + $0x48] sm:$0xff]  ;;  %v143_v13 = vmul.f32 1.442695, %v114_v8  ;;  %v115_v19 = vld [vmem:[#allocation8 + $0x70] sm:$0xff] }
  0x56   :  { %v394_v17 = vpop.eup %393  ;;  %413 = vpow2.f32 %v137_v60  ;;  %v145_v27 = vmul.f32 1.442695, %v115_v19  ;;  %v275_v60 = vld [vmem:[%s686_s5] sm:$0x1]  ;;  %s515_s5 = scalar_lea.vmem %s297_s30, 128 }
  0x57   :  { %v396_v20 = vpop.eup %395  ;;  %v165_v22 = vmul.f32 %v394_v17, %v149_v14  ;;  %415 = vpow2.f32 %v139_v61  ;;  %v93_v17 = vld [vmem:[#allocation6 + $0x40] sm:$0xff]  ;;  %v276_v61 = vmul.f32 1.442695, %v275_v60  ;;  %p516_p4 = scmp.ne.s32.totalorder %s297_s30, %s515_s5  ;;  %p521_p6 = scmp.lt.s32.totalorder %s515_s5, %s515_s5 }
  0x58   :  { %v398_v25 = vpop.eup %397  ;;  %v166_v26 = vmul.f32 %v396_v20, %v150_v15  ;;  %417 = vpow2.f32 %v141_v12 }
  0x59   :  { %v400_v28 = vpop.eup %399  ;;  %v181_v29 = vadd.f32 %v165_v22, %v85_v18  ;;  %v167_v32 = vmul.f32 %v398_v25, %v151_v23  ;;  %v94_v18 = vld [vmem:[#allocation6 + $0x48] sm:$0xff]  ;;  %419 = vpow2.f32 %v143_v13  ;;  %v116_v23 = vld [vmem:[#allocation8 + $0x78] sm:$0xff]  ;;  %v159_v25 = vld [vmem:[#allocation9 + $0x50] sm:$0xff]  ;;  %p522_p7 = por %p521_p6, %p520_p5 }
  0x5a   :  { %v182_v31 = vadd.f32 %v166_v26, %v86_v21  ;;  %v168_v33 = vmul.f32 %v400_v28, %v152_v24  ;;  %v402_v38 = vpop.eup %401  ;;  %v160_v26 = vld [vmem:[#allocation9 + $0x58] sm:$0xff]  ;;  %v147_v28 = vmul.f32 1.442695, %v116_v23  ;;  %421 = vpow2.f32 %v145_v27 }
  0x5b   :  { %v183_v39 = vadd.f32 %v167_v32, %v87_v34  ;;  %v404_v42 = vpop.eup %403  ;;  %v169_v48 = vmul.f32 %v402_v38, %v153_v43  ;;  %v95_v32 = vld [vmem:[#allocation6 + $0x50] sm:$0xff]  ;;  %v161_v38 = vld [vmem:[#allocation9 + $0x60] sm:$0xff]  ;;  %p523_p8 = pnand %p522_p7, %p516_p4 }
  0x5c   :  { %v360_v36 = vpack.c.bf16 %v182_v31, %v181_v29  ;;  %v184_v40 = vadd.f32 %v168_v33, %v88_v35  ;;  %v170_v49 = vmul.f32 %v404_v42, %v154_v44  ;;  %v406_v53 = vpop.eup %405  ;;  %v96_v33 = vld [vmem:[#allocation6 + $0x58] sm:$0xff]  ;;  %423 = vpow2.f32 %v147_v28  ;;  %v97_v43 = vld [vmem:[#allocation6 + $0x60] sm:$0xff]  ;;  %v98_v44 = vld [vmem:[#allocation6 + $0x68] sm:$0xff] }
  0x5d   :  { %v185_v54 = vadd.f32 %v169_v48, %v89_v50  ;;  %v408_v57 = vpop.eup %407  ;;  %v171_v63 = vmul.f32 %v406_v53, %v155_v58  ;;  %v164_v50 = vld [vmem:[#allocation9 + $0x78] sm:$0xff]  ;;  %425 = vpow2.f32 %v276_v61 }
  0x5e   :  { %361 = vmatpush3.bf16.xpose.msra.mxu0 %v360_v36  ;;  %v363_v47 = vpack.c.bf16 %v184_v40, %v183_v39  ;;  %v186_v55 = vadd.f32 %v170_v49, %v90_v51  ;;  %v172_v1 = vmul.f32 %v408_v57, %v156_v59  ;;  %v410_v5 = vpop.eup %409  ;;  %v162_v39 = vld [vmem:[#allocation9 + $0x68] sm:$0xff]  ;;  %v163_v49 = vld [vmem:[#allocation9 + $0x70] sm:$0xff]  ;;  %v198_v59 = vld [vmem:[#allocation3] sm:$0xff] }
  0x5f   :  { %362 = vmatprep.subr.bf16.mxu0 %v551_v0  ;;  %v187_v6 = vadd.f32 %v171_v63, %v91_v2  ;;  %v412_v9 = vpop.eup %411  ;;  %v173_v15 = vmul.f32 %v410_v5, %v157_v10 }
  0x60   :  { %v366_v62 = vpack.c.bf16 %v186_v55, %v185_v54  ;;  %v188_v7 = vadd.f32 %v172_v1, %v92_v3  ;;  %v174_v16 = vmul.f32 %v412_v9, %v158_v11  ;;  %v414_v20 = vpop.eup %413  ;;  %v99_v54 = vld [vmem:[#allocation6 + $0x70] sm:$0xff]  ;;  %v100_v55 = vld [vmem:[#allocation6 + $0x78] sm:$0xff] }
  0x61   :  { %v189_v21 = vadd.f32 %v173_v15, %v93_v17  ;;  %v416_v24 = vpop.eup %415  ;;  %v175_v30 = vmul.f32 %v414_v20, %v159_v25  ;;  %v278_v1 = vld [vmem:[%s687_s6] sm:$0x1] }
  0x62   :  { %v369_v14 = vpack.c.bf16 %v188_v7, %v187_v6  ;;  %v190_v22 = vadd.f32 %v174_v16, %v94_v18  ;;  %v176_v31 = vmul.f32 %v416_v24, %v160_v26  ;;  %v418_v34 = vpop.eup %417 }
  0x63   :  { %v191_v35 = vadd.f32 %v175_v30, %v95_v32  ;;  %v420_v37 = vpop.eup %419  ;;  %v177_v41 = vmul.f32 %v418_v34, %v161_v38 }
  0x64   :  { %v372_v29 = vpack.c.bf16 %v190_v22, %v189_v21  ;;  %v192_v36 = vadd.f32 %v176_v31, %v96_v33  ;;  %v178_v42 = vmul.f32 %v420_v37, %v162_v39  ;;  %v422_v45 = vpop.eup %421 }
  0x65   :  { %v193_v46 = vadd.f32 %v177_v41, %v97_v43  ;;  %v179_v52 = vmul.f32 %v422_v45, %v163_v49 }
  0x66   :  { %364 = vmatpush3.bf16.xpose.msra.mxu0 %v363_v47  ;;  %v375_v40 = vpack.c.bf16 %v192_v36, %v191_v35  ;;  %v194_v47 = vadd.f32 %v178_v42, %v98_v44  ;;  %v424_v48 = vpop.eup %423 }
  0x67   :  { %365 = vmatprep.subr.bf16.mxu0 %v551_v0  ;;  %v180_v53 = vmul.f32 %v424_v48, %v164_v50  ;;  %v195_v56 = vadd.f32 %v179_v52, %v99_v54  ;;  %v426_v63 = vpop.eup %425 }
  0x68   :  { %v378_v51 = vpack.c.bf16 %v194_v47, %v193_v46  ;;  %v279_v2 = vmul.f32 %v426_v63, %v278_v1 }
  0x69   :  { %v196_v57 = vadd.f32 %v180_v53, %v100_v55 }
  0x6b   :  { %v381_v58 = vpack.c.bf16 %v196_v57, %v195_v56 }
  0x6e   :  { %367 = vmatpush3.bf16.xpose.msra.mxu0 %v366_v62  ;;  %v283_v62 = vlaneseq }
  0x6f   :  { %368 = vmatprep.subr.bf16.mxu0 %v551_v0 }
  0x70   :  { %v284_v3 = vshrl.u32 %v283_v62, 7 }
  0x72   :  { %v285_v5 = vsub.s32 0, %v284_v3 }
  0x76   :  { %370 = vmatpush3.bf16.xpose.msra.mxu0 %v369_v14 }
  0x77   :  { %371 = vmatprep.subr.bf16.mxu0 %v551_v0 }
  0x7e   :  { %373 = vmatpush3.bf16.xpose.msra.mxu0 %v372_v29 }
  0x7f   :  { %374 = vmatprep.subr.bf16.mxu0 %v551_v0 }
  0x86   :  { %376 = vmatpush3.bf16.xpose.msra.mxu0 %v375_v40 }
  0x87   :  { %377 = vmatprep.subr.bf16.mxu0 %v551_v0 }
  0x8e   :  { %379 = vmatpush3.bf16.xpose.msra.mxu0 %v378_v51 }
  0x8f   :  { %380 = vmatprep.subr.bf16.mxu0 %v551_v0  ;;  %v274_v0 = vld [vmem:[%s685_s4] sm:$0x1] }
  0x90   :  { %v280_v4 = vadd.f32 %v279_v2, %v274_v0 }
  0x92   :  { %v286_v6 = vrot.slane %v280_v4, %v285_v5 }
  0x96   :  { %382 = vmatpush3.bf16.xpose.msra.mxu0 %v381_v58 }
  0x9d   :  { %357 = vmatmul.mubr.f32.vlgmr.msra.gmra.mrb[0].mxu0 %v198_v59 }
 0x170   :  { %v265_v7 = vpop.f32.mrb[0].mxu0 }
 0x171   :  { %v288_v8 = vadd.f32 %v286_v6, %v265_v7  ;;  %v358_v9 = vpop.f32.mrb[1].mxu0 }
 0x173   :  { %289 = vst [vmem:[#allocation11] sm:$0xff] %v288_v8 }
 0x174   :  { %526 = shalt.err (!%p523_p8)
}
 0x175   :  { %s527_s4 = scalar_lea.hbm %s688_s7, 128 }
 0x176   :  { %p528_p9 = scmp.ne.s32.totalorder %s688_s7, %s527_s4  ;;  %p531_p10 = scmp.lt.u32.totalorder %s527_s4, %s688_s7 }
 0x178   :  { %p533_p11 = pnand %p531_p10, %p528_p9 }
 0x17a   :  { %536 = shalt.err (!%p533_p11)
}
 0x17b   :  { %299 = dma.vmem_to_hbm [thread:$0]  %s297_s30, 128, %s688_s7, [#allocation5]  }
 0x17c   :  { %543 = dma.done.wait [#allocation5], 128  }
 0x17d   :  { %544 = vsyncadd [#allocation5], 4294967168 }
 0x17e   :  { %303 = vsyncpa [#allocation4], 1 }
 0x17f   :  { %304 = vsyncpa [#allocation7], 1 }
 0x180   :  { %305 = vsyncpa [#allocation10], 1 }
 0x181   :  { %306 = vsyncpa [#allocation5], 1 }

</bundles_post_ra>
